<compile_context>
chip_gen: v7x
topology: tpu7x:2x2x1
jax: 0.10.0
libtpu: 0.0.40
codegen_flags: <defaults>
</compile_context>

<pallas_src>
import jax
import jax.numpy as jnp
from jax import lax
from jax.experimental import pallas as pl
from jax.experimental.pallas import tpu as pltpu


def _rsr_kernel(z_ref, a_ref, o_ref):
    # z_ref: (TB, D), a_ref: (d_pad, D)  ->  o_ref: (TB, d_pad)
    # Contract over D (axis 1 of both operands); RHS is consumed transposed by
    # the MXU via dimension_numbers, so no transpose pass over HBM is needed.
    o_ref[...] = lax.dot_general(
        z_ref[...],
        a_ref[...],
        dimension_numbers=(((1,), (1,)), ((), ())),
        preferred_element_type=jnp.float32,
    ).astype(o_ref.dtype)


def rsr_layer(z: jax.Array, A: jax.Array, *, tb: int = 512) -> jax.Array:
    """Pallas implementation of RSRLayer.forward.

    z: (B, D) float32
    A: (d, D) float32
    returns: (B, d) float32  (== z @ A.T)
    """
    B, D = z.shape
    d, D2 = A.shape
    assert D == D2, "A and z dimension mismatch"

    # Lane-dense output: pad the feature dim up to a multiple of 128.
    d_pad = pl.cdiv(d, 128) * 128
    A_p = jnp.pad(A, ((0, d_pad - d), (0, 0))) if d_pad != d else A

    # Batch tile: multiple of 8 sublanes (f32), capped at `tb` (sized so that
    # 2 double-buffers x (TB*D + TB*d_pad) * 4B + A stays far below even the
    # v7x 32 MiB scoped-VMEM default).
    TB = min(tb, max(8, pl.cdiv(B, 8) * 8))
    B_pad = pl.cdiv(B, TB) * TB
    z_p = jnp.pad(z, ((0, B_pad - B), (0, 0))) if B_pad != B else z

    grid = (B_pad // TB,)

    cost = pl.CostEstimate(
        flops=2 * B_pad * D * d_pad,
        transcendentals=0,
        bytes_accessed=4 * (B_pad * D + d_pad * D + B_pad * d_pad),
    )

    out = pl.pallas_call(
        _rsr_kernel,
        out_shape=jax.ShapeDtypeStruct((B_pad, d_pad), z.dtype),
        grid_spec=pl.GridSpec(
            grid=grid,
            in_specs=[
                pl.BlockSpec((TB, D), lambda i: (i, 0)),        # z tile streams
                pl.BlockSpec((d_pad, D), lambda i: (0, 0)),     # A resident
            ],
            out_specs=pl.BlockSpec((TB, d_pad), lambda i: (i, 0)),
        ),
        compiler_params=pltpu.CompilerParams(
            # Batch tiles are independent -> shard across v7x's 2 TensorCores.
            dimension_semantics=("parallel",),
        ),
        cost_estimate=cost,
    )(z_p, A_p)

    return out[:B, :d]


def orthogonal_init(key, d: int, D: int, dtype=jnp.float32) -> jax.Array:
    """Deterministic orthogonal init matching torch.nn.init.orthogonal_ semantics
    (row-orthonormal for d <= D)."""
    rows, cols = d, D
    flat = jax.random.normal(key, (rows, cols), dtype=jnp.float32)
    if rows < cols:
        flat = flat.T
    q, r = jnp.linalg.qr(flat)
    # Sign correction to make the decomposition unique (as torch does); avoid
    # jnp.sign's 0-for-0 behavior.
    diag = jnp.diag(r)
    dsign = jnp.where(diag >= 0, 1.0, -1.0).astype(q.dtype)
    q = q * dsign[None, :]
    if rows < cols:
        q = q.T
    return q.astype(dtype)


if __name__ == "__main__":
    key = jax.random.PRNGKey(0)
    k_a, k_z = jax.random.split(key)

    d, D = 16, 32
    B = 8

    A = orthogonal_init(k_a, d, D)                           # (d, D)
    z = jax.random.normal(k_z, (B, D), dtype=jnp.float32)    # (B, D)

    # NOTE: for shapes this small, fused XLA (jnp.einsum) is likely faster than
    # a custom-call launch; the Pallas path pays off at large B where batch
    # tiling / pipelining and the lane-dense output matter.
    out = rsr_layer(z, A)
    out = jax.block_until_ready(out)

    # Reference check against plain JAX (same math as PyTorch forward).
    ref = (A @ z[:, :, None])[:, :, 0]
    assert out.shape == (B, d)
    assert jnp.allclose(out, ref, atol=1e-5, rtol=1e-5), "mismatch vs reference"

    print("KERNEL_OK")
</pallas_src>

<mosaic_0001>
module attributes {stable_mosaic.version = 11 : i64} {
  func.func @_rsr_kernel(%arg0: i32, %arg1: memref<8x32xf32, #tpu.memory_space<vmem>>, %arg2: memref<128x32xf32, #tpu.memory_space<vmem>>, %arg3: memref<8x128xf32, #tpu.memory_space<vmem>>) attributes {dimension_semantics = [#tpu.dimension_semantics<parallel>], iteration_bounds = array<i64: 1>, scalar_prefetch = 0 : i64, scratch_operands = 0 : i64, tpu.core_type = #tpu.core_type<tc>, window_params = [{transform_indices = @transform_0, window_bounds = array<i64: 8, 32>}, {pipeline_mode = #tpu.pipeline_mode<synchronous>, transform_indices = @transform_1, window_bounds = array<i64: 128, 32>}, {transform_indices = @transform_2, window_bounds = array<i64: 8, 128>}]} {
    %c0 = arith.constant 0 : index
    %c0_0 = arith.constant 0 : index
    %0 = vector.load %arg1[%c0, %c0_0] : memref<8x32xf32, #tpu.memory_space<vmem>>, vector<8x32xf32>
    %c0_1 = arith.constant 0 : index
    %c0_2 = arith.constant 0 : index
    %1 = vector.load %arg2[%c0_1, %c0_2] : memref<128x32xf32, #tpu.memory_space<vmem>>, vector<128x32xf32>
    %cst = arith.constant dense<0.000000e+00> : vector<8x128xf32>
    %2 = tpu.matmul %0, %1, %cst {dimension_numbers = #tpu.dot_dimension_numbers<[1], [1], [0], [0], [0, 0, 1, 0], [], []>} : vector<8x32xf32>, vector<128x32xf32>, vector<8x128xf32> -> vector<8x128xf32>
    %c0_3 = arith.constant 0 : index
    %c0_4 = arith.constant 0 : index
    %3 = vector.load %arg3[%c0_3, %c0_4] : memref<8x128xf32, #tpu.memory_space<vmem>>, vector<8x128xf32>
    tpu.vector_store %arg3[%c0_3, %c0_4], %2 {strides = array<i32>} : memref<8x128xf32, #tpu.memory_space<vmem>>, vector<8x128xf32>,
    return
  }
  func.func @transform_0(%arg0: i32) -> (i32, i32) {
    %c0_i32 = arith.constant 0 : i32
    %c0_i32_0 = arith.constant 0 : i32
    return %arg0, %c0_i32 : i32, i32
  }
  func.func @transform_1(%arg0: i32) -> (i32, i32) {
    %c0_i32 = arith.constant 0 : i32
    %c0_i32_0 = arith.constant 0 : i32
    %c0_i32_1 = arith.constant 0 : i32
    return %c0_i32, %c0_i32_0 : i32, i32
  }
  func.func @transform_2(%arg0: i32) -> (i32, i32) {
    %c0_i32 = arith.constant 0 : i32
    %c0_i32_0 = arith.constant 0 : i32
    return %arg0, %c0_i32 : i32, i32
  }
}

</mosaic_0001>

<bundles_post_ra>
// kernel: tpu_custom_call.1
= control target key start
LH: loop header
LB: loop body
LE: loop exit
PB: predicated region body
PF: predicated region fallthrough
CT: control target
= control target key end

     0   :  { %vm29_vm0 = vcmask 261120   ;;  %v295_v2 = vmov 0.0|0.0   ;;  %vm296_vm2 = vmmov 0   ;;  %v297_v5 = vmov 0.0   ;;  %s400_s0 = inlined_call_operand.vmem [shape: f32[8,32], index: 0, kind: input, shape index: {}]   ;;  %s401_s1 = inlined_call_operand.vmem [shape: f32[128,32], index: 1, kind: input, shape index: {}]   ;;  %s402_s2 = inlined_call_operand.hbm [shape: f32[8,128], index: 2, kind: output, shape index: {}]  }
   0x1   :  { %v13_v0 = vld [vmem:[%s401_s1] sm:$0xff]  ;;  %v14_v1 = vld [vmem:[%s401_s1 + $0x8] sm:$0xff]  ;;  %235 = vmatprep.subr.bf16.mxu0 %v295_v2  ;;  %vm322_vm1 = vmpackc.low %vm29_vm0, %vm29_vm0  ;;  %232 = vmatprep.mubr.msk.f32.mxu0 %vm296_vm2, %v297_v5 }
   0x2   :  { %v236_v3 = vpack.c.bf16 %v14_v1, %v13_v0  ;;  %v15_v6 = vld [vmem:[%s401_s1 + $0x10] sm:$0xff]  ;;  %v16_v7 = vld [vmem:[%s401_s1 + $0x18] sm:$0xff] }
   0x4   :  { %238 = vmatpush3.bf16.xpose.msk.msra.mxu0 %vm322_vm1, %v236_v3 }
   0x5   :  { %239 = vmatprep.subr.bf16.mxu0 %v295_v2 }
   0x6   :  { %7 = vsyncpa [#allocation3], 0  ;;  %v240_v8 = vpack.c.bf16 %v16_v7, %v15_v6  ;;  %v17_v9 = vld [vmem:[%s401_s1 + $0x20] sm:$0xff]  ;;  %v18_v10 = vld [vmem:[%s401_s1 + $0x28] sm:$0xff]  ;;  %s298_s15 = smov [#allocation2]  }
   0x7   :  { %v244_v11 = vpack.c.bf16 %v18_v10, %v17_v9  ;;  %v19_v12 = vld [vmem:[%s401_s1 + $0x30] sm:$0xff]  ;;  %v20_v13 = vld [vmem:[%s401_s1 + $0x38] sm:$0xff]  ;;  %v21_v15 = vld [vmem:[%s401_s1 + $0x40] sm:$0xff]  ;;  %s158_s16 = sshll.u32 %s298_s15, 4  ;;  %s159_s16 = int_to_ptr.vmem [resolvable:$true] %s158_s16 }
   0x8   :  { %v248_v14 = vpack.c.bf16 %v20_v13, %v19_v12  ;;  %v22_v16 = vld [vmem:[%s401_s1 + $0x48] sm:$0xff]  ;;  %v23_v18 = vld [vmem:[%s401_s1 + $0x50] sm:$0xff]  ;;  %v24_v19 = vld [vmem:[%s401_s1 + $0x58] sm:$0xff]  ;;  %s271_s17 = scalar_lea.vmem %s159_s16, 128  ;;  %p276_p1 = scmp.lt.s32.totalorder %s159_s16, %s159_s16 }
   0x9   :  { %v252_v17 = vpack.c.bf16 %v22_v16, %v21_v15  ;;  %v256_v20 = vpack.c.bf16 %v24_v19, %v23_v18  ;;  %v25_v21 = vld [vmem:[%s401_s1 + $0x60] sm:$0xff]  ;;  %v26_v22 = vld [vmem:[%s401_s1 + $0x68] sm:$0xff]  ;;  %v27_v24 = vld [vmem:[%s401_s1 + $0x70] sm:$0xff]  ;;  %p272_p0 = scmp.ne.s32.totalorder %s159_s16, %s271_s17  ;;  %p277_p2 = scmp.lt.s32.totalorder %s271_s17, %s271_s17 }
   0xa   :  { %v260_v23 = vpack.c.bf16 %v26_v22, %v25_v21  ;;  %v28_v25 = vld [vmem:[%s401_s1 + $0x78] sm:$0xff]  ;;  %v12_v27 = vld [vmem:[%s400_s0] sm:$0xff] }
   0xb   :  { %v264_v26 = vpack.c.bf16 %v28_v25, %v27_v24  ;;  %p278_p3 = por %p277_p2, %p276_p1 }
   0xc   :  { %242 = vmatpush3.bf16.xpose.msk.msra.mxu0 %vm322_vm1, %v240_v8 }
   0xd   :  { %243 = vmatprep.subr.bf16.mxu0 %v295_v2  ;;  %p279_p4 = pnand %p278_p3, %p272_p0 }
  0x14   :  { %246 = vmatpush3.bf16.xpose.msk.msra.mxu0 %vm322_vm1, %v244_v11 }
  0x15   :  { %247 = vmatprep.subr.bf16.mxu0 %v295_v2 }
  0x1c   :  { %250 = vmatpush3.bf16.xpose.msk.msra.mxu0 %vm322_vm1, %v248_v14 }
  0x1d   :  { %251 = vmatprep.subr.bf16.mxu0 %v295_v2 }
  0x24   :  { %254 = vmatpush3.bf16.xpose.msk.msra.mxu0 %vm322_vm1, %v252_v17 }
  0x25   :  { %255 = vmatprep.subr.bf16.mxu0 %v295_v2 }
  0x2c   :  { %258 = vmatpush3.bf16.xpose.msk.msra.mxu0 %vm322_vm1, %v256_v20 }
  0x2d   :  { %259 = vmatprep.subr.bf16.mxu0 %v295_v2 }
  0x34   :  { %262 = vmatpush3.bf16.xpose.msk.msra.mxu0 %vm322_vm1, %v260_v23 }
  0x35   :  { %263 = vmatprep.subr.bf16.mxu0 %v295_v2 }
  0x3c   :  { %266 = vmatpush3.bf16.xpose.msk.msra.mxu0 %vm322_vm1, %v264_v26 }
  0x43   :  { %233 = vmatmul.mubr.msk.f32.vlgmr.msra.gmra.mrb[0].mxu0 %vm29_vm0, %v12_v27 }
 0x116   :  { %v147_v28 = vpop.f32.mrb[0].mxu0 }
 0x117   :  { %151 = vst [vmem:[#allocation2] sm:$0xff] %v147_v28  ;;  %v234_v29 = vpop.f32.mrb[1].mxu0 }
 0x118   :  { %282 = shalt.err (!%p279_p4)
}
 0x119   :  { %s283_s19 = scalar_lea.hbm %s402_s2, 128 }
 0x11a   :  { %p284_p5 = scmp.ne.s32.totalorder %s402_s2, %s283_s19  ;;  %p287_p6 = scmp.lt.u32.totalorder %s283_s19, %s402_s2 }
 0x11c   :  { %p289_p7 = pnand %p287_p6, %p284_p5 }
 0x11e   :  { %292 = shalt.err (!%p289_p7)
}
 0x11f   :  { %161 = dma.vmem_to_hbm [thread:$0]  %s159_s16, 128, %s402_s2, [#allocation3]  }
 0x120   :  { %293 = dma.done.wait [#allocation3], 128  }
 0x121   :  { %294 = vsyncadd [#allocation3], 4294967168 }
 0x122   :  { %165 = vsyncpa [#allocation3], 1 }

</bundles_post_ra>
